<compile_context>
chip_gen: v6e
topology: v6e:2x2x1
jax: 0.10.0
libtpu: 0.0.40
codegen_flags: <defaults>
</compile_context>

<pallas_src>
import functools

import numpy as np
import jax
import jax.numpy as jnp
from jax.experimental import pallas as pl
from jax.experimental.pallas import tpu as pltpu

CONF = [128, 96, 64]          # scaled-down version of the torch default [1024, 512, 256]
C_OUT = 64                    # conv1 out_channels (hard-coded in the torch module)
KSIZE = 64                    # conv1 kernel size   (hard-coded in the torch module)
LANE = 128                    # TPU lane width; matmul output dims are padded to it
MATMUL_DTYPE = jnp.bfloat16   # MXU operand dtype; accumulation is always f32
MAX_BATCH_BLOCK = 2048        # (2048, 128) f32 activations ~1 MiB -> VMEM-safe everywhere


# ---------------------------------------------------------------------------
# Fused forward kernel: conv1 -> fc1 -> (dropout) -> fc2 -> conv1 -> lastLinear
# ---------------------------------------------------------------------------
def conv1_fused_kernel(x_ref, wc1_ref, w1_ref, w2_ref, wc2_ref, wl_ref, b_ref,
                       o_ref):
    """Whole Conv1.forward for one batch tile; intermediates never leave VMEM.

    Weights are (In, Out) bf16, zero-padded to 128-lane outputs; b_ref packs
    the five (already padded) biases as rows 0..4 of an (8, 128) f32 tile.
    """

    def matmul_bias_relu(act, w_ref, bias_row):
        y = jnp.dot(act.astype(w_ref.dtype), w_ref[...],
                    preferred_element_type=jnp.float32)
        return jnp.maximum(y + b_ref[bias_row:bias_row + 1, :], 0.0)

    h = matmul_bias_relu(x_ref[...], wc1_ref, 0)   # relu(conv1)       (bb, 128)
    h = matmul_bias_relu(h, w1_ref, 1)             # relu(fc1)         (bb, 128) [96 real]
    # Dropout(p=0.1): relu(dropout(h)) == h at inference (h is already >= 0).
    # TODO(synk): training-mode dropout (mask + 1/(1-p) scaling) not implemented.
    h = matmul_bias_relu(h, w2_ref, 2)             # relu(fc2)         (bb, 128) [64 real]
    h = matmul_bias_relu(h, wc2_ref, 3)            # relu(conv1)       (bb, 128) [64 real]
    h = matmul_bias_relu(h, wl_ref, 4)             # relu(lastLinear)  (bb, 128)
    o_ref[...] = h.astype(o_ref.dtype)


# ---------------------------------------------------------------------------
# Host-side parameter packing (one-time)
# ---------------------------------------------------------------------------
def _conv1d_toeplitz(conv_w, T):
    """(C, K) conv weight -> dense (L, C*T) matrix, L = T + K - 1.

    Column order is PyTorch's NCW flatten order (c*T + t), so
    (x @ W)[b, c*T + t] == Conv1d(x)[b, c, t] and no transpose is needed.
    """
    w = np.asarray(conv_w, np.float32)
    C, K = w.shape
    L = T + K - 1
    dense = np.zeros((L, C * T), np.float32)
    for c in range(C):
        for t in range(T):
            dense[t:t + K, c * T + t] = w[c]
    return dense


def _pad2d(a, rows, cols):
    a = np.asarray(a, np.float32)
    return np.pad(a, ((0, rows - a.shape[0]), (0, cols - a.shape[1])))


def _pad1d(a, n):
    a = np.asarray(a, np.float32)
    return np.pad(a, (0, n - a.shape[0]))


def init_params(key):
    """Parameters in PyTorch layout: Conv1d weight (C,1,K) squeezed to (C,K),
    Linear weights (Out, In); Linear biases in `fc` are zeroed (init_network),
    conv/lastLinear biases use torch's default uniform init."""
    ks = jax.random.split(key, 6)

    def xavier(k, shape):
        fan_out, fan_in = shape
        a = (6.0 / (fan_in + fan_out)) ** 0.5
        return jax.random.uniform(k, shape, jnp.float32, -a, a)

    def default_bias(k, n, fan_in):
        a = 1.0 / (fan_in ** 0.5)
        return jax.random.uniform(k, (n,), jnp.float32, -a, a)

    t2 = CONF[2] - KSIZE + 1                       # second-conv output length
    return {
        "conv_w": xavier(ks[0], (C_OUT, KSIZE)),
        "conv_b": default_bias(ks[1], C_OUT, KSIZE),
        "fc1_w": xavier(ks[2], (CONF[1], CONF[0])),
        "fc1_b": jnp.zeros((CONF[1],), jnp.float32),
        "fc2_w": xavier(ks[3], (CONF[2], CONF[1])),
        "fc2_b": jnp.zeros((CONF[2],), jnp.float32),
        # torch re-creates lastLinear with fresh random weights every forward;
        # here it is a fixed deterministic parameter of the same shape.
        # TODO(synk): per-call re-randomized lastLinear is not reproduced.
        "last_w": xavier(ks[4], (CONF[0], C_OUT * t2)),
        "last_b": default_bias(ks[5], CONF[0], C_OUT * t2),
    }


def prepare_inference_params(params):
    """One-time host-side repack:
       * both conv1 call sites -> banded/Toeplitz matmul weights (NCW order),
       * all matmul weights pre-transposed to (In, Out), zero-padded so every
         output (and every contraction except the first) is 128-lane wide,
         cast to bf16,
       * all five biases padded to 128 and packed into one (8, 128) f32 tile.
    Zero padding is exact: padded bias lanes give relu(0)=0 and padded weight
    rows are zero, so real output lanes are bit-identical to the unpadded math.
    """
    C, K = params["conv_w"].shape
    t1 = CONF[0] // C                    # first-conv output length  (input L = t1 + K - 1)
    t2 = CONF[2] - K + 1                 # second-conv output length
    assert C * t1 == CONF[0] and C * t2 <= LANE and CONF[0] == LANE

    conv_w = np.asarray(params["conv_w"], np.float32)
    conv_b = np.asarray(params["conv_b"], np.float32)

    def mx(a, rows, cols):               # matmul operand: zero-padded (In, Out), MXU dtype
        return jnp.asarray(_pad2d(a, rows, cols), MATMUL_DTYPE)

    wc1 = _conv1d_toeplitz(conv_w, t1)                        # (65, 128)
    wc2 = _conv1d_toeplitz(conv_w, t2)                        # (64, 64)

    biases = np.zeros((8, LANE), np.float32)                  # one aligned (8,128) tile
    biases[0] = _pad1d(np.repeat(conv_b, t1), LANE)           # conv bias in (c*T + t) order
    biases[1] = _pad1d(params["fc1_b"], LANE)
    biases[2] = _pad1d(params["fc2_b"], LANE)
    biases[3] = _pad1d(np.repeat(conv_b, t2), LANE)
    biases[4] = _pad1d(params["last_b"], LANE)

    return {
        "wc1": mx(wc1, wc1.shape[0], LANE),                               # (65, 128); K=65 kept (full-dim block)
        "w1": mx(np.asarray(params["fc1_w"], np.float32).T, LANE, LANE),  # (128, 128) [96 real cols]
        "w2": mx(np.asarray(params["fc2_w"], np.float32).T, LANE, LANE),  # (128, 128) [96x64 real]
        "wc2": mx(wc2, LANE, LANE),                                       # (128, 128) [64x64 real]
        "wl": mx(np.asarray(params["last_w"], np.float32).T, LANE, LANE), # (128, 128) [64x128 real]
        "biases": jnp.asarray(biases),                                    # (8, 128) f32
    }


# ---------------------------------------------------------------------------
# Batch tiling / pipeline-mode probing
# ---------------------------------------------------------------------------
def _pick_batch_block(batch):
    """Large tiles amortize the ~0.35us per-grid-step overhead; cap at
    floor(B/2) rounded down to a multiple of 8 so the "parallel" axis keeps
    >=2 programs to shard across v7x's two TensorCores.  Minimum 8 rows for
    sublane alignment; non-divisible batches are tail-padded by the wrapper."""
    half = (batch // 2) // 8 * 8
    return int(min(MAX_BATCH_BLOCK, max(8, half)))


_SINGLE_BUFFER_SUPPORTED = None


def _single_buffer_weights_supported():
    """True if this Pallas build accepts pl.Buffered(1) (single-buffering for
    resident operands whose block index never changes).  Probed once with a
    tiny kernel; falls back to the default double-buffered pipeline if not."""
    global _SINGLE_BUFFER_SUPPORTED
    if _SINGLE_BUFFER_SUPPORTED is None:
        def _probe_kernel(w_ref, o_ref):
            o_ref[...] = w_ref[...] + 1.0

        try:
            probe = pl.pallas_call(
                _probe_kernel,
                out_shape=jax.ShapeDtypeStruct((16, LANE), jnp.float32),
                grid=(2,),
                in_specs=[pl.BlockSpec((8, LANE), lambda i: (0, 0),
                                       pipeline_mode=pl.Buffered(1))],
                out_specs=pl.BlockSpec((8, LANE), lambda i: (i, 0)),
            )
            jax.jit(probe).lower(
                jax.ShapeDtypeStruct((8, LANE), jnp.float32)).compile()
            _SINGLE_BUFFER_SUPPORTED = True
        except Exception:                 # pragma: no cover - older Pallas builds
            _SINGLE_BUFFER_SUPPORTED = False
    return _SINGLE_BUFFER_SUPPORTED


# ---------------------------------------------------------------------------
# Forward wrapper: one fused pallas_call
# ---------------------------------------------------------------------------
@functools.partial(jax.jit, static_argnums=(2,))
def _conv1_forward_impl(x, prep, single_buffer_weights):
    B, L = x.shape
    bb = _pick_batch_block(B)
    grid_b = pl.cdiv(B, bb)
    Bp = grid_b * bb

    # bf16 at the HBM boundary (halves kernel input bytes).  Callers that can
    # produce bf16 directly should pass it so this convert disappears / fuses.
    xq = x if x.dtype == MATMUL_DTYPE else x.astype(MATMUL_DTYPE)
    if Bp != B:                                   # tail padding (no giant single tile)
        xq = jnp.pad(xq, ((0, Bp - B), (0, 0)))

    mats = (prep["wc1"], prep["w1"], prep["w2"], prep["wc2"], prep["wl"])
    biases = prep["biases"]
    n_out = mats[-1].shape[1]                     # 128 (== CONF[0])

    flops = 2 * Bp * sum(int(w.shape[0]) * int(w.shape[1]) for w in mats)
    bytes_accessed = int(
        Bp * L * xq.dtype.itemsize + Bp * n_out * 4
        + sum(int(w.size) * w.dtype.itemsize for w in mats)
        + int(biases.size) * biases.dtype.itemsize)

    # Resident operands (constant index_map): single-buffer when supported.
    resident = (dict(pipeline_mode=pl.Buffered(1))
                if single_buffer_weights else {})
    in_specs = ([pl.BlockSpec((bb, L), lambda i: (i, 0))]
                + [pl.BlockSpec(w.shape, lambda i: (0, 0), **resident)
                   for w in mats]
                + [pl.BlockSpec(biases.shape, lambda i: (0, 0), **resident)])

    out = pl.pallas_call(
        conv1_fused_kernel,
        out_shape=jax.ShapeDtypeStruct((Bp, n_out), jnp.float32),
        grid=(grid_b,),
        in_specs=in_specs,
        out_specs=pl.BlockSpec((bb, n_out), lambda i: (i, 0)),
        compiler_params=pltpu.CompilerParams(
            dimension_semantics=("parallel",),
            vmem_limit_bytes=32 * 1024 * 1024),
        cost_estimate=pl.CostEstimate(flops=flops, transcendentals=0,
                                      bytes_accessed=bytes_accessed),
    )(xq, *mats, biases)
    return out[:B, :CONF[0]], None


def conv1_forward(x, prep):
    return _conv1_forward_impl(x, prep, _single_buffer_weights_supported())


# ---------------------------------------------------------------------------
# Pure-JAX reference (mirrors the torch graph literally: NCW conv + channel-
# major flatten), using the same bf16-operand / f32-accumulate policy.
# ---------------------------------------------------------------------------
def _reference_forward(x, params):
    def bf16(v):
        return v.astype(MATMUL_DTYPE)

    def conv_relu_flat(h):                               # h: (B, Lh) f32
        C, K = params["conv_w"].shape
        T = h.shape[1] - K + 1
        patches = jnp.stack([h[:, t:t + K] for t in range(T)], axis=1)   # (B, T, K)
        y = jnp.einsum("btk,ck->bct", bf16(patches), bf16(params["conv_w"]),
                       preferred_element_type=jnp.float32)
        y = y + params["conv_b"][None, :, None]
        return jnp.maximum(y, 0.0).reshape(h.shape[0], -1)   # torch NCW flatten

    def lin_relu(h, w, b):
        y = jnp.dot(bf16(h), bf16(w).T, preferred_element_type=jnp.float32)
        return jnp.maximum(y + b[None, :], 0.0)

    h = conv_relu_flat(x)
    h = lin_relu(h, params["fc1_w"], params["fc1_b"])
    h = lin_relu(h, params["fc2_w"], params["fc2_b"])
    h = conv_relu_flat(h)
    h = lin_relu(h, params["last_w"], params["last_b"])
    return h


if __name__ == "__main__":
    key = jax.random.PRNGKey(0)
    pkey, xkey = jax.random.split(key)
    params = init_params(pkey)
    prep = prepare_inference_params(params)

    # Per-sample length L must satisfy C_OUT * (L - KSIZE + 1) == CONF[0]  =>  L = 65
    L = CONF[0] // C_OUT + KSIZE - 1

    # ---- B=2: latency-bound, single-tile path (matches torch usage) ---------
    x_small = jax.random.normal(xkey, (2, L), jnp.float32)
    out, aux = conv1_forward(x_small, prep)
    jax.block_until_ready(out)
    assert out.shape == (2, CONF[0]), out.shape
    assert aux is None
    assert bool(jnp.all(out >= 0.0))                       # final relu
    ref = _reference_forward(x_small, params)
    assert bool(jnp.allclose(out, ref, rtol=5e-2, atol=5e-2)), \
        float(jnp.max(jnp.abs(out - ref)))

    # ---- B=300: multi-tile grid + non-divisible tail + bf16 HBM boundary ----
    xkey2 = jax.random.fold_in(xkey, 1)
    x_big = jax.random.normal(xkey2, (300, L), jnp.float32)
    out_big, _ = conv1_forward(x_big.astype(MATMUL_DTYPE), prep)
    jax.block_until_ready(out_big)
    assert out_big.shape == (300, CONF[0]), out_big.shape
    assert bool(jnp.all(out_big >= 0.0))
    ref_big = _reference_forward(x_big, params)
    assert bool(jnp.allclose(out_big, ref_big, rtol=5e-2, atol=5e-2)), \
        float(jnp.max(jnp.abs(out_big - ref_big)))

    print("KERNEL_OK")
</pallas_src>

<mosaic_0001>
module attributes {stable_mosaic.version = 11 : i64} {
  func.func @conv1_fused_kernel(%arg0: i32, %arg1: memref<8x65xbf16, #tpu.memory_space<vmem>>, %arg2: memref<65x128xbf16, #tpu.memory_space<vmem>>, %arg3: memref<128x128xbf16, #tpu.memory_space<vmem>>, %arg4: memref<128x128xbf16, #tpu.memory_space<vmem>>, %arg5: memref<128x128xbf16, #tpu.memory_space<vmem>>, %arg6: memref<128x128xbf16, #tpu.memory_space<vmem>>, %arg7: memref<8x128xf32, #tpu.memory_space<vmem>>, %arg8: memref<8x128xf32, #tpu.memory_space<vmem>>) attributes {dimension_semantics = [#tpu.dimension_semantics<parallel>], iteration_bounds = array<i64: 1>, scalar_prefetch = 0 : i64, scratch_operands = 0 : i64, tpu.core_type = #tpu.core_type<tc>, window_params = [{transform_indices = @transform_0, window_bounds = array<i64: 8, 65>}, {pipeline_mode = #tpu.pipeline_mode<synchronous>, transform_indices = @transform_1, window_bounds = array<i64: 65, 128>}, {pipeline_mode = #tpu.pipeline_mode<synchronous>, transform_indices = @transform_2, window_bounds = array<i64: 128, 128>}, {pipeline_mode = #tpu.pipeline_mode<synchronous>, transform_indices = @transform_3, window_bounds = array<i64: 128, 128>}, {pipeline_mode = #tpu.pipeline_mode<synchronous>, transform_indices = @transform_4, window_bounds = array<i64: 128, 128>}, {pipeline_mode = #tpu.pipeline_mode<synchronous>, transform_indices = @transform_5, window_bounds = array<i64: 128, 128>}, {pipeline_mode = #tpu.pipeline_mode<synchronous>, transform_indices = @transform_6, window_bounds = array<i64: 8, 128>}, {transform_indices = @transform_7, window_bounds = array<i64: 8, 128>}]} {
    %c0 = arith.constant 0 : index
    %c0_0 = arith.constant 0 : index
    %0 = vector.load %arg1[%c0, %c0_0] : memref<8x65xbf16, #tpu.memory_space<vmem>>, vector<8x65xbf16>
    %c0_1 = arith.constant 0 : index
    %c0_2 = arith.constant 0 : index
    %1 = vector.load %arg2[%c0_1, %c0_2] : memref<65x128xbf16, #tpu.memory_space<vmem>>, vector<65x128xbf16>
    %cst = arith.constant dense<0.000000e+00> : vector<8x128xf32>
    %2 = tpu.matmul %0, %1, %cst {dimension_numbers = #tpu.dot_dimension_numbers<[1], [0], [0], [1], [0, 0, 1, 1], [], []>} : vector<8x65xbf16>, vector<65x128xbf16>, vector<8x128xf32> -> vector<8x128xf32>
    %c0_3 = arith.constant 0 : index
    %c0_4 = arith.constant 0 : index
    %3 = vector.load %arg7[%c0_3, %c0_4] : memref<8x128xf32, #tpu.memory_space<vmem>>, vector<1x128xf32>
    %4 = vector.broadcast %3 : vector<1x128xf32> to vector<8x128xf32>
    %5 = arith.addf %2, %4 : vector<8x128xf32>
    %cst_5 = arith.constant 0.000000e+00 : f32
    %6 = vector.broadcast %cst_5 : f32 to vector<8x128xf32>
    %7 = arith.maximumf %5, %6 : vector<8x128xf32>
    %8 = arith.truncf %7 : vector<8x128xf32> to vector<8x128xbf16>
    %c0_6 = arith.constant 0 : index
    %c0_7 = arith.constant 0 : index
    %9 = vector.load %arg3[%c0_6, %c0_7] : memref<128x128xbf16, #tpu.memory_space<vmem>>, vector<128x128xbf16>
    %cst_8 = arith.constant dense<0.000000e+00> : vector<8x128xf32>
    %10 = tpu.matmul %8, %9, %cst_8 {dimension_numbers = #tpu.dot_dimension_numbers<[1], [0], [0], [1], [0, 0, 1, 1], [], []>} : vector<8x128xbf16>, vector<128x128xbf16>, vector<8x128xf32> -> vector<8x128xf32>
    %c1 = arith.constant 1 : index
    %c0_9 = arith.constant 0 : index
    %11 = vector.load %arg7[%c1, %c0_9] : memref<8x128xf32, #tpu.memory_space<vmem>>, vector<1x128xf32>
    %12 = vector.broadcast %11 : vector<1x128xf32> to vector<8x128xf32>
    %13 = arith.addf %10, %12 : vector<8x128xf32>
    %cst_10 = arith.constant 0.000000e+00 : f32
    %14 = vector.broadcast %cst_10 : f32 to vector<8x128xf32>
    %15 = arith.maximumf %13, %14 : vector<8x128xf32>
    %16 = arith.truncf %15 : vector<8x128xf32> to vector<8x128xbf16>
    %c0_11 = arith.constant 0 : index
    %c0_12 = arith.constant 0 : index
    %17 = vector.load %arg4[%c0_11, %c0_12] : memref<128x128xbf16, #tpu.memory_space<vmem>>, vector<128x128xbf16>
    %cst_13 = arith.constant dense<0.000000e+00> : vector<8x128xf32>
    %18 = tpu.matmul %16, %17, %cst_13 {dimension_numbers = #tpu.dot_dimension_numbers<[1], [0], [0], [1], [0, 0, 1, 1], [], []>} : vector<8x128xbf16>, vector<128x128xbf16>, vector<8x128xf32> -> vector<8x128xf32>
    %c2 = arith.constant 2 : index
    %c0_14 = arith.constant 0 : index
    %19 = vector.load %arg7[%c2, %c0_14] : memref<8x128xf32, #tpu.memory_space<vmem>>, vector<1x128xf32>
    %20 = vector.broadcast %19 : vector<1x128xf32> to vector<8x128xf32>
    %21 = arith.addf %18, %20 : vector<8x128xf32>
    %cst_15 = arith.constant 0.000000e+00 : f32
    %22 = vector.broadcast %cst_15 : f32 to vector<8x128xf32>
    %23 = arith.maximumf %21, %22 : vector<8x128xf32>
    %24 = arith.truncf %23 : vector<8x128xf32> to vector<8x128xbf16>
    %c0_16 = arith.constant 0 : index
    %c0_17 = arith.constant 0 : index
    %25 = vector.load %arg5[%c0_16, %c0_17] : memref<128x128xbf16, #tpu.memory_space<vmem>>, vector<128x128xbf16>
    %cst_18 = arith.constant dense<0.000000e+00> : vector<8x128xf32>
    %26 = tpu.matmul %24, %25, %cst_18 {dimension_numbers = #tpu.dot_dimension_numbers<[1], [0], [0], [1], [0, 0, 1, 1], [], []>} : vector<8x128xbf16>, vector<128x128xbf16>, vector<8x128xf32> -> vector<8x128xf32>
    %c3 = arith.constant 3 : index
    %c0_19 = arith.constant 0 : index
    %27 = vector.load %arg7[%c3, %c0_19] : memref<8x128xf32, #tpu.memory_space<vmem>>, vector<1x128xf32>
    %28 = vector.broadcast %27 : vector<1x128xf32> to vector<8x128xf32>
    %29 = arith.addf %26, %28 : vector<8x128xf32>
    %cst_20 = arith.constant 0.000000e+00 : f32
    %30 = vector.broadcast %cst_20 : f32 to vector<8x128xf32>
    %31 = arith.maximumf %29, %30 : vector<8x128xf32>
    %32 = arith.truncf %31 : vector<8x128xf32> to vector<8x128xbf16>
    %c0_21 = arith.constant 0 : index
    %c0_22 = arith.constant 0 : index
    %33 = vector.load %arg6[%c0_21, %c0_22] : memref<128x128xbf16, #tpu.memory_space<vmem>>, vector<128x128xbf16>
    %cst_23 = arith.constant dense<0.000000e+00> : vector<8x128xf32>
    %34 = tpu.matmul %32, %33, %cst_23 {dimension_numbers = #tpu.dot_dimension_numbers<[1], [0], [0], [1], [0, 0, 1, 1], [], []>} : vector<8x128xbf16>, vector<128x128xbf16>, vector<8x128xf32> -> vector<8x128xf32>
    %c4 = arith.constant 4 : index
    %c0_24 = arith.constant 0 : index
    %35 = vector.load %arg7[%c4, %c0_24] : memref<8x128xf32, #tpu.memory_space<vmem>>, vector<1x128xf32>
    %36 = vector.broadcast %35 : vector<1x128xf32> to vector<8x128xf32>
    %37 = arith.addf %34, %36 : vector<8x128xf32>
    %cst_25 = arith.constant 0.000000e+00 : f32
    %38 = vector.broadcast %cst_25 : f32 to vector<8x128xf32>
    %39 = arith.maximumf %37, %38 : vector<8x128xf32>
    %c0_26 = arith.constant 0 : index
    %c0_27 = arith.constant 0 : index
    %40 = vector.load %arg8[%c0_26, %c0_27] : memref<8x128xf32, #tpu.memory_space<vmem>>, vector<8x128xf32>
    tpu.vector_store %arg8[%c0_26, %c0_27], %39 {strides = array<i32>} : memref<8x128xf32, #tpu.memory_space<vmem>>, vector<8x128xf32>,
    return
  }
  func.func @transform_0(%arg0: i32) -> (i32, i32) {
    %c0_i32 = arith.constant 0 : i32
    %c0_i32_0 = arith.constant 0 : i32
    return %arg0, %c0_i32 : i32, i32
  }
  func.func @transform_1(%arg0: i32) -> (i32, i32) {
    %c0_i32 = arith.constant 0 : i32
    %c0_i32_0 = arith.constant 0 : i32
    %c0_i32_1 = arith.constant 0 : i32
    return %c0_i32, %c0_i32_0 : i32, i32
  }
  func.func @transform_2(%arg0: i32) -> (i32, i32) {
    %c0_i32 = arith.constant 0 : i32
    %c0_i32_0 = arith.constant 0 : i32
    %c0_i32_1 = arith.constant 0 : i32
    return %c0_i32, %c0_i32_0 : i32, i32
  }
  func.func @transform_3(%arg0: i32) -> (i32, i32) {
    %c0_i32 = arith.constant 0 : i32
    %c0_i32_0 = arith.constant 0 : i32
    %c0_i32_1 = arith.constant 0 : i32
    return %c0_i32, %c0_i32_0 : i32, i32
  }
  func.func @transform_4(%arg0: i32) -> (i32, i32) {
    %c0_i32 = arith.constant 0 : i32
    %c0_i32_0 = arith.constant 0 : i32
    %c0_i32_1 = arith.constant 0 : i32
    return %c0_i32, %c0_i32_0 : i32, i32
  }
  func.func @transform_5(%arg0: i32) -> (i32, i32) {
    %c0_i32 = arith.constant 0 : i32
    %c0_i32_0 = arith.constant 0 : i32
    %c0_i32_1 = arith.constant 0 : i32
    return %c0_i32, %c0_i32_0 : i32, i32
  }
  func.func @transform_6(%arg0: i32) -> (i32, i32) {
    %c0_i32 = arith.constant 0 : i32
    %c0_i32_0 = arith.constant 0 : i32
    %c0_i32_1 = arith.constant 0 : i32
    return %c0_i32, %c0_i32_0 : i32, i32
  }
  func.func @transform_7(%arg0: i32) -> (i32, i32) {
    %c0_i32 = arith.constant 0 : i32
    %c0_i32_0 = arith.constant 0 : i32
    return %arg0, %c0_i32 : i32, i32
  }
}

</mosaic_0001>

<bundles_post_ra>
// kernel: _conv1_forward_impl.1
= control target key start
LH: loop header
LB: loop body
LE: loop exit
PB: predicated region body
PF: predicated region fallthrough
CT: control target
= control target key end

     0   :  { %12 = vsyncpa [#allocation3], 0  ;;  %s1121_s0 = inlined_call_operand.vmem [shape: bf16[8,65], index: 0, kind: input, shape index: {}]   ;;  %s1122_s1 = inlined_call_operand.hbm [shape: bf16[65,128], index: 1, kind: input, shape index: {}]   ;;  %s1123_s2 = inlined_call_operand.hbm [shape: bf16[128,128], index: 2, kind: input, shape index: {}]   ;;  %s1124_s3 = inlined_call_operand.hbm [shape: bf16[128,128], index: 3, kind: input, shape index: {}]   ;;  %s1125_s4 = inlined_call_operand.hbm [shape: bf16[128,128], index: 4, kind: input, shape index: {}]   ;;  %s1126_s5 = inlined_call_operand.hbm [shape: bf16[128,128], index: 5, kind: input, shape index: {}]   ;;  %s1127_s6 = inlined_call_operand.vmem [shape: f32[8,128], index: 6, kind: input, shape index: {}]   ;;  %s1128_s7 = inlined_call_operand.vmem [shape: f32[8,128], index: 7, kind: output, shape index: {}]  }
   0x1   :  { %13 = vsyncpa [#allocation5], 0 }
   0x2   :  { %14 = vsyncpa [#allocation8], 0  ;;  %s972_s24 = smov [#allocation4]   ;;  %s973_s26 = smov [#allocation7]  }
   0x3   :  { %s34_s25 = sshll.u32 %s972_s24, 4  ;;  %s58_s27 = sshll.u32 %s973_s26, 4  ;;  %s35_s25 = int_to_ptr.vmem [resolvable:$true] %s34_s25  ;;  %s59_s27 = int_to_ptr.vmem [resolvable:$true] %s58_s27 }
   0x4   :  { %s874_s28 = scalar_lea.vmem %s35_s25, 1024  ;;  %p879_p1 = scmp.lt.s32.totalorder %s35_s25, %s35_s25 }
   0x5   :  { %p875_p0 = scmp.ne.s32.totalorder %s35_s25, %s874_s28  ;;  %p880_p2 = scmp.lt.s32.totalorder %s874_s28, %s874_s28 }
   0x7   :  { %p881_p3 = por %p880_p2, %p879_p1 }
   0x9   :  { %p882_p4 = pnand %p881_p3, %p875_p0 }
   0xb   :  { %885 = shalt.err (!%p882_p4)
}
   0xc   :  { %s974_s29 = smov 64   ;;  %s975_s30 = smov 4  }
   0xd   :  { %40 = dma.hbm_to_vmem [thread:$0]  %s1123_s2, 1024, %s35_s25, [#allocation5], %s974_s29, %s974_s29, %s975_s30  }
   0xe   :  { %s894_s10 = scalar_lea.vmem %s59_s27, 1024  ;;  %p899_p6 = scmp.lt.s32.totalorder %s59_s27, %s59_s27 }
   0xf   :  { %p895_p5 = scmp.ne.s32.totalorder %s59_s27, %s894_s10  ;;  %p900_p7 = scmp.lt.s32.totalorder %s894_s10, %s894_s10 }
  0x11   :  { %p901_p8 = por %p900_p7, %p899_p6 }
  0x13   :  { %p902_p9 = pnand %p901_p8, %p895_p5 }
  0x15   :  { %905 = shalt.err (!%p902_p9)
}
  0x16   :  { %64 = dma.hbm_to_vmem [thread:$0]  %s1125_s4, 1024, %s59_s27, [#allocation8], %s974_s29, %s974_s29, %s975_s30  }
  0x17   :  { %s976_s13 = smov [#allocation2]   ;;  %s977_s15 = smov [#allocation6]  }
  0x18   :  { %s22_s14 = sshll.u32 %s976_s13, 4  ;;  %s46_s16 = sshll.u32 %s977_s15, 4  ;;  %s23_s14 = int_to_ptr.vmem [resolvable:$true] %s22_s14  ;;  %s47_s16 = int_to_ptr.vmem [resolvable:$true] %s46_s16 }
  0x19   :  { %s914_s2 = scalar_lea.vmem %s23_s14, 576  ;;  %p919_p11 = scmp.lt.s32.totalorder %s23_s14, %s23_s14 }
  0x1a   :  { %p915_p10 = scmp.ne.s32.totalorder %s23_s14, %s914_s2  ;;  %p920_p12 = scmp.lt.s32.totalorder %s914_s2, %s914_s2 }
  0x1c   :  { %p921_p13 = por %p920_p12, %p919_p11 }
  0x1e   :  { %p922_p0 = pnand %p921_p13, %p915_p10 }
  0x20   :  { %925 = shalt.err (!%p922_p0)
}
  0x21   :  { %28 = dma.hbm_to_vmem [thread:$0]  %s1122_s1, 576, %s23_s14, [#allocation3], %s974_s29, %s974_s29, %s975_s30  }
  0x22   :  { %s934_s4 = scalar_lea.vmem %s47_s16, 1024  ;;  %p939_p2 = scmp.lt.s32.totalorder %s47_s16, %s47_s16 }
  0x23   :  { %p935_p1 = scmp.ne.s32.totalorder %s47_s16, %s934_s4  ;;  %p940_p3 = scmp.lt.s32.totalorder %s934_s4, %s934_s4 }
  0x25   :  { %p941_p4 = por %p940_p3, %p939_p2 }
  0x27   :  { %p942_p5 = pnand %p941_p4, %p935_p1 }
  0x29   :  { %945 = shalt.err (!%p942_p5)
}
  0x2a   :  { %52 = dma.hbm_to_vmem [thread:$0]  %s1124_s3, 1024, %s47_s16, [#allocation5], %s974_s29, %s974_s29, %s975_s30  }
  0x2b   :  { %s978_s21 = smov [#allocation9]  }
  0x2c   :  { %s70_s22 = sshll.u32 %s978_s21, 4  ;;  %s71_s22 = int_to_ptr.vmem [resolvable:$true] %s70_s22 }
  0x2d   :  { %s954_s23 = scalar_lea.vmem %s71_s22, 1024  ;;  %p959_p7 = scmp.lt.s32.totalorder %s71_s22, %s71_s22 }
  0x2e   :  { %p955_p6 = scmp.ne.s32.totalorder %s71_s22, %s954_s23  ;;  %p960_p8 = scmp.lt.s32.totalorder %s954_s23, %s954_s23 }
  0x30   :  { %p961_p9 = por %p960_p8, %p959_p7 }
  0x32   :  { %p962_p10 = pnand %p961_p9, %p955_p6 }
  0x34   :  { %965 = shalt.err (!%p962_p10)
}
  0x35   :  { %76 = dma.hbm_to_vmem [thread:$0]  %s1126_s5, 1024, %s71_s22, [#allocation8], %s974_s29, %s974_s29, %s975_s30  }
  0x36   :  { %966 = dma.done.wait [#allocation3], 576  }
  0x37   :  { %967 = vsyncadd [#allocation3], 4294966720 }
  0x38   :  { %968 = dma.done.wait [#allocation5], 2048  }
  0x39   :  { %969 = vsyncadd [#allocation5], 4294965248 }
  0x3a   :  { %970 = dma.done.wait [#allocation8], 2048  }
  0x3b   :  { %971 = vsyncadd [#allocation8], 4294965248  ;;  %v979_v0 = vmov 0.0   ;;  %vm980_vm0 = vmmov 0   ;;  %vm141_vm1 = vcmask 1040384   ;;  %v981_v1 = vmov 0  }
  0x3c   :  { %725 = vmatprep.subr.bf16.mxu0 %v979_v0  ;;  %735 = vmatprep.mubr.msk.bf16.mxu0 %vm980_vm0, %v979_v0  ;;  %v143_v2 = vsel %vm141_vm1, 65535, %v981_v1  ;;  %v829_v3 = vld [vmem:[#allocation2 + $0x20] ss:$0 sps:$4 sm:$0x11]   ;;  %v830_v5 = vld [vmem:[#allocation2 + $0x18] sm:$0xff]   ;;  %v831_v8 = vld [vmem:[#allocation2 + $0x10] sm:$0xff]  }
  0x3d   :  { %739 = vmatprep.subr.bf16.mxu1 %v979_v0  ;;  %755 = vmatprep.mubr.msk.bf16.mxu1 %vm980_vm0, %v979_v0  ;;  %v145_v4 = vand.u32 %v829_v3, %v143_v2  ;;  %v834_v6 = vld [vmem:[#allocation4 + $0x38] sm:$0xff]   ;;  %v835_v7 = vld [vmem:[#allocation4 + $0x30] sm:$0xff]   ;;  %v832_v9 = vld [vmem:[#allocation2 + $0x8] sm:$0xff]   ;;  %vm137_vm2 = vcmask 531456  }
  0x3e   :  { %740 = vmatpush3.bf16.msra.mxu1 %v834_v6  ;;  %v836_v10 = vld [vmem:[#allocation4 + $0x28] sm:$0xff]   ;;  %v837_v11 = vld [vmem:[#allocation4 + $0x20] sm:$0xff]   ;;  %v838_v13 = vld [vmem:[#allocation4 + $0x18] sm:$0xff]  }
  0x3f   :  { %726 = vmatpush3.bf16.msra.mxu0 %v145_v4  ;;  %741 = vmatprep.subr.bf16.mxu1 %v979_v0  ;;  %v833_v12 = vld [vmem:[#allocation2] sm:$0xff]   ;;  %v839_v15 = vld [vmem:[#allocation4 + $0x10] sm:$0xff]   ;;  %v840_v16 = vld [vmem:[#allocation4 + $0x8] sm:$0xff]  }
  0x40   :  { %727 = vmatprep.subr.bf16.mxu0 %v979_v0  ;;  %v95_v14 = vld [vmem:[%s1121_s0] sm:$0xf]  ;;  %v841_v17 = vld [vmem:[#allocation4] sm:$0xff]   ;;  %v843_v19 = vld [vmem:[#allocation6 + $0x30] sm:$0xff]  }
  0x41   :  { %v842_v18 = vld [vmem:[#allocation6 + $0x38] sm:$0xff]   ;;  %v844_v20 = vld [vmem:[#allocation6 + $0x28] sm:$0xff]   ;;  %v845_v21 = vld [vmem:[#allocation6 + $0x20] sm:$0xff]  }
  0x42   :  { %742 = vmatpush3.bf16.msra.mxu1 %v835_v7  ;;  %v846_v22 = vld [vmem:[#allocation6 + $0x18] sm:$0xff]   ;;  %v847_v23 = vld [vmem:[#allocation6 + $0x10] sm:$0xff]   ;;  %v848_v32 = vld [vmem:[#allocation6 + $0x8] sm:$0xff]  }
  0x43   :  { %728 = vmatpush3.bf16.msra.mxu0 %v830_v5  ;;  %743 = vmatprep.subr.bf16.mxu1 %v979_v0  ;;  %v640_v24 = vld [vmem:[%s1127_s6] ss:$0 sm:$0xff]  ;;  %v849_v33 = vld [vmem:[#allocation6] sm:$0xff]   ;;  %v851_v35 = vld [vmem:[#allocation7 + $0x30] sm:$0xff]  }
  0x44   :  { %729 = vmatprep.subr.bf16.mxu0 %v979_v0  ;;  %v850_v34 = vld [vmem:[#allocation7 + $0x38] sm:$0xff]   ;;  %v852_v36 = vld [vmem:[#allocation7 + $0x28] sm:$0xff]   ;;  %v853_v37 = vld [vmem:[#allocation7 + $0x20] sm:$0xff]  }
  0x45   :  { %v854_v38 = vld [vmem:[#allocation7 + $0x18] sm:$0xff]   ;;  %v855_v39 = vld [vmem:[#allocation7 + $0x10] sm:$0xff]   ;;  %v856_v48 = vld [vmem:[#allocation7 + $0x8] sm:$0xff]  }
  0x46   :  { %744 = vmatpush3.bf16.msra.mxu1 %v836_v10  ;;  %v647_v40 = vld [vmem:[%s1127_s6 + $0x1] ss:$0 sm:$0xff]  ;;  %v857_v49 = vld [vmem:[#allocation7] sm:$0xff]   ;;  %v859_v51 = vld [vmem:[#allocation9 + $0x30] sm:$0xff]  }
  0x47   :  { %730 = vmatpush3.bf16.msra.mxu0 %v831_v8  ;;  %745 = vmatprep.subr.bf16.mxu1 %v979_v0  ;;  %v858_v50 = vld [vmem:[#allocation9 + $0x38] sm:$0xff]   ;;  %v860_v52 = vld [vmem:[#allocation9 + $0x28] sm:$0xff]   ;;  %v861_v53 = vld [vmem:[#allocation9 + $0x20] sm:$0xff]  }
  0x48   :  { %731 = vmatprep.subr.bf16.mxu0 %v979_v0  ;;  %v862_v54 = vld [vmem:[#allocation9 + $0x18] sm:$0xff]   ;;  %v863_v55 = vld [vmem:[#allocation9 + $0x10] sm:$0xff]   ;;  %v864_v1 = vld [vmem:[#allocation9 + $0x8] sm:$0xff]  }
  0x49   :  { %v656_v56 = vld [vmem:[%s1127_s6 + $0x2] ss:$0 sm:$0xff]  ;;  %v865_v2 = vld [vmem:[#allocation9] sm:$0xff]   ;;  %v665_v3 = vld [vmem:[%s1127_s6 + $0x3] ss:$0 sm:$0xff] }
  0x4a   :  { %746 = vmatpush3.bf16.msra.mxu1 %v837_v11  ;;  %v674_v11 = vld [vmem:[%s1127_s6 + $0x4] ss:$0 sm:$0xff] }
  0x4b   :  { %732 = vmatpush3.bf16.msra.mxu0 %v832_v9  ;;  %747 = vmatprep.subr.bf16.mxu1 %v979_v0 }
  0x4c   :  { %733 = vmatprep.subr.bf16.mxu0 %v979_v0 }
  0x4e   :  { %748 = vmatpush3.bf16.msra.mxu1 %v838_v13 }
  0x4f   :  { %734 = vmatpush3.bf16.msra.mxu0 %v833_v12  ;;  %749 = vmatprep.subr.bf16.mxu1 %v979_v0 }
  0x50   :  { %759 = vmatprep.subr.bf16.mxu0 %v979_v0 }
  0x52   :  { %736 = vmatmul.mubr.msk.bf16.vlgmr.msra.gmra.mxu0 %vm137_vm2, %v95_v14  ;;  %750 = vmatpush3.bf16.msra.mxu1 %v839_v15 }
  0x53   :  { %775 = vmatprep.mubr.msk.bf16.mxu0 %vm980_vm0, %v979_v0  ;;  %751 = vmatprep.subr.bf16.mxu1 %v979_v0 }
  0x54   :  { %760 = vmatpush3.bf16.msra.mxu0 %v842_v18 }
  0x55   :  { %761 = vmatprep.subr.bf16.mxu0 %v979_v0 }
  0x56   :  { %752 = vmatpush3.bf16.msra.mxu1 %v840_v16 }
  0x57   :  { %753 = vmatprep.subr.bf16.mxu1 %v979_v0 }
  0x58   :  { %762 = vmatpush3.bf16.msra.mxu0 %v843_v19 }
  0x59   :  { %763 = vmatprep.subr.bf16.mxu0 %v979_v0 }
  0x5a   :  { %754 = vmatpush3.bf16.msra.mxu1 %v841_v17 }
  0x5b   :  { %779 = vmatprep.subr.bf16.mxu1 %v979_v0 }
  0x5c   :  { %764 = vmatpush3.bf16.msra.mxu0 %v844_v20 }
  0x5d   :  { %765 = vmatprep.subr.bf16.mxu0 %v979_v0 }
  0x60   :  { %766 = vmatpush3.bf16.msra.mxu0 %v845_v21 }
  0x61   :  { %767 = vmatprep.subr.bf16.mxu0 %v979_v0 }
  0x64   :  { %768 = vmatpush3.bf16.msra.mxu0 %v846_v22 }
  0x65   :  { %769 = vmatprep.subr.bf16.mxu0 %v979_v0 }
  0x68   :  { %770 = vmatpush3.bf16.msra.mxu0 %v847_v23 }
  0x69   :  { %771 = vmatprep.subr.bf16.mxu0 %v979_v0 }
  0x6c   :  { %772 = vmatpush3.bf16.msra.mxu0 %v848_v32 }
  0x6d   :  { %773 = vmatprep.subr.bf16.mxu0 %v979_v0 }
  0x70   :  { %774 = vmatpush3.bf16.msra.mxu0 %v849_v33 }
  0x71   :  { %799 = vmatprep.subr.bf16.mxu0 %v979_v0 }
 0x112   :  { %v181_v25 = vpop.f32.mrf.mxu0 }
 0x113   :  { %v182_v26 = vadd.f32 %v640_v24, %v181_v25 }
 0x114   :  { %v737_v27 = vpop.f32.mrf.mxu0 }
 0x115   :  { %v187_v28 = vmax.f32 %v182_v26, 0.0 }
 0x116   :  { %v184_v29 = vpop.f32.mrf.mxu0 }
 0x117   :  { %v188_v30 = vpack.c.bf16 %v187_v28, %v187_v28 }
 0x118   :  { %v738_v31 = vpop.f32.mrf.mxu0 }
 0x119   :  { %756 = vmatmul.mubr.bf16.vlgmr.msra.gmra.mxu1 %v188_v30 }
 0x11a   :  { %795 = vmatprep.mubr.msk.bf16.mxu1 %vm980_vm0, %v979_v0  ;;  %780 = vmatpush3.bf16.msra.mxu1 %v850_v34 }
 0x11b   :  { %781 = vmatprep.subr.bf16.mxu1 %v979_v0 }
 0x11e   :  { %782 = vmatpush3.bf16.msra.mxu1 %v851_v35 }
 0x11f   :  { %783 = vmatprep.subr.bf16.mxu1 %v979_v0 }
 0x122   :  { %784 = vmatpush3.bf16.msra.mxu1 %v852_v36 }
 0x123   :  { %785 = vmatprep.subr.bf16.mxu1 %v979_v0 }
 0x126   :  { %786 = vmatpush3.bf16.msra.mxu1 %v853_v37 }
 0x127   :  { %787 = vmatprep.subr.bf16.mxu1 %v979_v0 }
 0x12a   :  { %788 = vmatpush3.bf16.msra.mxu1 %v854_v38 }
 0x12b   :  { %789 = vmatprep.subr.bf16.mxu1 %v979_v0 }
 0x12e   :  { %790 = vmatpush3.bf16.msra.mxu1 %v855_v39 }
 0x12f   :  { %791 = vmatprep.subr.bf16.mxu1 %v979_v0 }
 0x132   :  { %792 = vmatpush3.bf16.msra.mxu1 %v856_v48 }
 0x133   :  { %793 = vmatprep.subr.bf16.mxu1 %v979_v0 }
 0x136   :  { %794 = vmatpush3.bf16.msra.mxu1 %v857_v49 }
 0x1d9   :  { %v292_v41 = vpop.f32.mrf.mxu1 }
 0x1da   :  { %v293_v42 = vadd.f32 %v647_v40, %v292_v41 }
 0x1db   :  { %v757_v43 = vpop.f32.mrf.mxu1 }
 0x1dc   :  { %v298_v44 = vmax.f32 %v293_v42, 0.0 }
 0x1dd   :  { %v295_v45 = vpop.f32.mrf.mxu1 }
 0x1de   :  { %v299_v46 = vpack.c.bf16 %v298_v44, %v298_v44 }
 0x1df   :  { %v758_v47 = vpop.f32.mrf.mxu1 }
 0x1e0   :  { %776 = vmatmul.mubr.bf16.vlgmr.msra.gmra.mxu0 %v299_v46 }
 0x1e1   :  { %815 = vmatprep.mubr.msk.bf16.mxu0 %vm980_vm0, %v979_v0  ;;  %800 = vmatpush3.bf16.msra.mxu0 %v858_v50 }
 0x1e2   :  { %801 = vmatprep.subr.bf16.mxu0 %v979_v0 }
 0x1e5   :  { %802 = vmatpush3.bf16.msra.mxu0 %v859_v51 }
 0x1e6   :  { %803 = vmatprep.subr.bf16.mxu0 %v979_v0 }
 0x1e9   :  { %804 = vmatpush3.bf16.msra.mxu0 %v860_v52 }
 0x1ea   :  { %805 = vmatprep.subr.bf16.mxu0 %v979_v0 }
 0x1ed   :  { %806 = vmatpush3.bf16.msra.mxu0 %v861_v53 }
 0x1ee   :  { %807 = vmatprep.subr.bf16.mxu0 %v979_v0 }
 0x1f1   :  { %808 = vmatpush3.bf16.msra.mxu0 %v862_v54 }
 0x1f2   :  { %809 = vmatprep.subr.bf16.mxu0 %v979_v0 }
 0x1f5   :  { %810 = vmatpush3.bf16.msra.mxu0 %v863_v55 }
 0x1f6   :  { %811 = vmatprep.subr.bf16.mxu0 %v979_v0 }
 0x1f9   :  { %812 = vmatpush3.bf16.msra.mxu0 %v864_v1 }
 0x1fa   :  { %813 = vmatprep.subr.bf16.mxu0 %v979_v0 }
 0x1fd   :  { %814 = vmatpush3.bf16.msra.mxu0 %v865_v2 }
 0x2a0   :  { %v403_v57 = vpop.f32.mrf.mxu0 }
 0x2a1   :  { %v404_v58 = vadd.f32 %v656_v56, %v403_v57 }
 0x2a2   :  { %v777_v59 = vpop.f32.mrf.mxu0 }
 0x2a3   :  { %v409_v60 = vmax.f32 %v404_v58, 0.0 }
 0x2a4   :  { %v406_v61 = vpop.f32.mrf.mxu0 }
 0x2a5   :  { %v410_v62 = vpack.c.bf16 %v409_v60, %v409_v60 }
 0x2a6   :  { %v778_v63 = vpop.f32.mrf.mxu0 }
 0x2a7   :  { %796 = vmatmul.mubr.bf16.vlgmr.msra.gmra.mxu1 %v410_v62 }
 0x367   :  { %v514_v4 = vpop.f32.mrf.mxu1 }
 0x368   :  { %v515_v5 = vadd.f32 %v665_v3, %v514_v4 }
 0x369   :  { %v797_v6 = vpop.f32.mrf.mxu1 }
 0x36a   :  { %v520_v7 = vmax.f32 %v515_v5, 0.0 }
 0x36b   :  { %v517_v8 = vpop.f32.mrf.mxu1 }
 0x36c   :  { %v521_v9 = vpack.c.bf16 %v520_v7, %v520_v7 }
 0x36d   :  { %v798_v10 = vpop.f32.mrf.mxu1 }
 0x36e   :  { %816 = vmatmul.mubr.bf16.vlgmr.msra.gmra.mxu0 %v521_v9 }
 0x42e   :  { %v625_v12 = vpop.f32.mrf.mxu0 }
 0x42f   :  { %v626_v0 = vadd.f32 %v674_v11, %v625_v12 }
 0x430   :  { %v817_v13 = vpop.f32.mrf.mxu0 }
 0x431   :  { %v631_v14 = vmax.f32 %v626_v0, 0.0 }
 0x432   :  { %v628_v15 = vpop.f32.mrf.mxu0 }
 0x433   :  { %632 = vst [vmem:[%s1128_s7] sm:$0xff] %v631_v14 }
 0x434   :  { %v818_v16 = vpop.f32.mrf.mxu0 }
 0x435   :  { %637 = vsyncpa [#allocation3], 1 }
 0x436   :  { %638 = vsyncpa [#allocation5], 1 }
 0x437   :  { %639 = vsyncpa [#allocation8], 1 }

</bundles_post_ra>
